<compile_context>
chip_gen: v5e
topology: v5e:2x2
jax: 0.10.0
libtpu: 0.0.40
codegen_flags: <defaults>
</compile_context>

<pallas_src>
import math
from functools import partial

import jax
import jax.numpy as jnp
from jax import lax
from jax.experimental import pallas as pl
from jax.experimental.pallas import tpu as pltpu


# ------------------------------- kernel -------------------------------------


def _decoder_kernel(h0_ref, wg_ref, bg_ref, wd_ref, bd_ref, out_ref, hist_ref,
                    *, seq_len, hidden, cell, unroll):
    """Run the full seq_len recurrence for Bb batch rows in one program.

    wg/bg: pre-fused gate weights/biases (dense_dec1 folded into the input
           path; GRU r/z gates pre-summed) -> (H, 4H) for GRU, (H, H) for RNN.
    wd/bd: transposed output projection (H, F), applied once after the loop.
    hist_ref: VMEM scratch (seq_len*Bb, H) holding the hidden-state history.
    """
    H = hidden
    Bb = h0_ref.shape[1]                       # batch rows in this program
    wg = wg_ref[...]
    bg = bg_ref[...]
    h0 = h0_ref[0].astype(jnp.float32)         # (Bb, H)

    def step(t, h):
        # Single matmul on h produces all gate pre-activations (dense_dec1 is
        # folded into the input-gate weights).
        g = jnp.dot(h, wg, preferred_element_type=jnp.float32) + bg
        if cell == "gru":
            rz = jax.nn.sigmoid(g[:, :2 * H])          # folded r/z gates
            r = rz[:, :H]
            z = rz[:, H:]
            n = jnp.tanh(g[:, 2 * H:3 * H] + r * g[:, 3 * H:])
            h_new = (1.0 - z) * n + z * h
        else:                                          # vanilla RNNCell (tanh)
            h_new = jnp.tanh(g)

        # Only h is needed for the next step; park it in VMEM (t-major rows)
        # and keep the output projection off the serial chain.
        hist_ref[pl.ds(t * Bb, Bb), :] = h_new
        return h_new

    lax.fori_loop(0, seq_len, step, h0, unroll=unroll)

    # Deferred output projection: one well-shaped matmul + one slab store
    # instead of seq_len tiny matmuls and masked narrow stores per step.
    x = jnp.dot(hist_ref[...], wd_ref[...],
                preferred_element_type=jnp.float32) + bd_ref[...]
    out_ref[0] = x.astype(out_ref.dtype)


# ------------------------------ wrapper -------------------------------------


def pack_params(p, cell):
    """One-time weight repack (hoisted out of the forward path).

    Transposes PyTorch (out, in) weights to row-major matmul layout, folds
    dense_dec1 into the input-gate weights
        gates_in = h @ (Wd^T Wi^T) + (b_d Wi^T + b_ih)
    and (GRU) pre-sums the r/z input/hidden weights so the per-step gate
    matmul is (H, 4H) instead of (H, 6H).
    """
    wd_t = p["dense_w"].T                                  # (H, F)
    wi_t = p["weight_ih"].T                                # (F, GH)
    wh_t = p["weight_hh"].T                                # (H, GH)
    w_in = wd_t @ wi_t                                     # (H, GH)
    b_in = p["dense_b"][None, :] @ wi_t + p["bias_ih"][None, :]   # (1, GH)
    b_hh = p["bias_hh"][None, :]                                  # (1, GH)

    if cell == "gru":
        H = wh_t.shape[0]
        w_rz = w_in[:, :2 * H] + wh_t[:, :2 * H]
        b_rz = b_in[:, :2 * H] + b_hh[:, :2 * H]
        wg = jnp.concatenate([w_rz, w_in[:, 2 * H:], wh_t[:, 2 * H:]], axis=1)
        bg = jnp.concatenate([b_rz, b_in[:, 2 * H:], b_hh[:, 2 * H:]], axis=1)
    else:  # rnn
        wg = w_in + wh_t                                   # (H, H)
        bg = b_in + b_hh                                   # (1, H)
    return dict(wg=wg, bg=bg, wd=wd_t, bd=p["dense_b"][None, :])


def recurrent_decoder_forward(h_0, seq_len, packed, *, cell="gru",
                              num_blocks=1, unroll=8):
    """Equivalent of RecurrentDecoder.forward(h_0, seq_len).

    h_0: (1, B, latent_dim); seq_len must be a static Python int.
    num_blocks=1 (default) runs the whole batch in one program (best on
    v5e/v6e: the grid is a serial loop there); on v7x num_blocks=2 shards the
    batch across the two TensorCores via the "parallel" grid axis.
    Returns (B, seq_len, n_features).
    """
    _, B, H = h_0.shape
    F = packed["wd"].shape[1]
    assert B % num_blocks == 0, "batch must divide evenly into blocks"
    Bb = B // num_blocks
    u = max(1, min(unroll, seq_len))

    h = h_0[0].reshape(num_blocks, Bb, H)
    args = (h, packed["wg"], packed["bg"], packed["wd"], packed["bd"])

    def full_spec(a):
        nd = a.ndim
        return pl.BlockSpec(a.shape, lambda b, _nd=nd: (0,) * _nd)

    out = pl.pallas_call(
        partial(_decoder_kernel, seq_len=seq_len, hidden=H, cell=cell,
                unroll=u),
        out_shape=jax.ShapeDtypeStruct((num_blocks, seq_len * Bb, F),
                                       h_0.dtype),
        grid=(num_blocks,),
        in_specs=[pl.BlockSpec((1, Bb, H), lambda b: (b, 0, 0))]
                 + [full_spec(a) for a in args[1:]],
        out_specs=pl.BlockSpec((1, seq_len * Bb, F), lambda b: (b, 0, 0)),
        scratch_shapes=[pltpu.VMEM((seq_len * Bb, H), jnp.float32)],
        compiler_params=pltpu.CompilerParams(
            dimension_semantics=("parallel",)),
    )(*args)

    # Rows inside each batch block come out (t, b_local)-major; restoring the
    # (B, seq_len, F) ordering is cheap wrapper-side layout plumbing.
    out = out.reshape(num_blocks, seq_len, Bb, F)
    out = jnp.transpose(out, (0, 2, 1, 3)).reshape(B, seq_len, F)
    return out


# --------------------------- parameter init ---------------------------------


def init_params(key, latent_dim, n_features, cell):
    """Parameters in PyTorch layout (nn.GRUCell / nn.RNNCell / nn.Linear)."""
    gh = 3 * latent_dim if cell == "gru" else latent_dim
    ks = jax.random.split(key, 6)
    bound = 1.0 / math.sqrt(latent_dim)

    def u(k, shape):
        return jax.random.uniform(k, shape, jnp.float32, -bound, bound)

    return dict(
        weight_ih=u(ks[0], (gh, n_features)),   # rec_dec1.weight_ih
        weight_hh=u(ks[1], (gh, latent_dim)),   # rec_dec1.weight_hh
        bias_ih=u(ks[2], (gh,)),
        bias_hh=u(ks[3], (gh,)),
        dense_w=u(ks[4], (n_features, latent_dim)),   # dense_dec1.weight
        dense_b=u(ks[5], (n_features,)),              # dense_dec1.bias
    )


# ---------------------------- pure-JAX reference ----------------------------


def _reference_forward(h_0, seq_len, p, cell):
    """Faithful (non-fused) port of the PyTorch forward."""
    h = h_0[0]                                          # (B, H)
    H = h.shape[-1]
    x = h @ p["dense_w"].T + p["dense_b"]
    outs = []
    for _ in range(seq_len):
        gi = x @ p["weight_ih"].T + p["bias_ih"]
        gh = h @ p["weight_hh"].T + p["bias_hh"]
        if cell == "gru":
            r = jax.nn.sigmoid(gi[:, :H] + gh[:, :H])
            z = jax.nn.sigmoid(gi[:, H:2 * H] + gh[:, H:2 * H])
            n = jnp.tanh(gi[:, 2 * H:] + r * gh[:, 2 * H:])
            h = (1.0 - z) * n + z * h
        else:
            h = jnp.tanh(gi + gh)
        x = h @ p["dense_w"].T + p["dense_b"]
        outs.append(x)
    return jnp.stack(outs, axis=1)                      # (B, S, F)


# --------------------------------- main --------------------------------------


if __name__ == "__main__":
    # RecurrentDecoder(latent_dim, n_features, rnn_cell, device)
    latent_dim, n_features, seq_len, B = 32, 8, 8, 2

    key = jax.random.PRNGKey(0)
    kh, kgru, krnn = jax.random.split(key, 3)
    h_0 = jax.random.normal(kh, (1, B, latent_dim), jnp.float32)

    for cell, kp in (("gru", kgru), ("rnn", krnn)):
        params = init_params(kp, latent_dim, n_features, cell)
        packed = pack_params(params, cell)
        ref = _reference_forward(h_0, seq_len, params, cell)

        # num_blocks=1 is the v5e/v6e path (single program, whole batch in one
        # matmul per step); num_blocks=2 exercises the v7x 2-TensorCore split.
        for nb in (1, 2):
            out = recurrent_decoder_forward(h_0, seq_len, packed,
                                            cell=cell, num_blocks=nb)
            out = jax.block_until_ready(out)
            assert out.shape == (B, seq_len, n_features), out.shape
            max_err = float(jnp.max(jnp.abs(out - ref)))
            if not jnp.allclose(out, ref, atol=1e-3, rtol=1e-3):
                raise AssertionError(
                    f"{cell} (num_blocks={nb}): mismatch vs reference, "
                    f"max abs err = {max_err}")

    print("KERNEL_OK")
</pallas_src>

<mosaic_0001>
module attributes {stable_mosaic.version = 11 : i64} {
  func.func @_decoder_kernel(%arg0: i32, %arg1: memref<1x2x32xf32, #tpu.memory_space<vmem>>, %arg2: memref<32x128xf32, #tpu.memory_space<vmem>>, %arg3: memref<1x128xf32, #tpu.memory_space<vmem>>, %arg4: memref<32x8xf32, #tpu.memory_space<vmem>>, %arg5: memref<1x8xf32, #tpu.memory_space<vmem>>, %arg6: memref<1x16x8xf32, #tpu.memory_space<vmem>>, %arg7: memref<16x32xf32, #tpu.memory_space<vmem>>) attributes {dimension_semantics = [#tpu.dimension_semantics<parallel>], iteration_bounds = array<i64: 1>, scalar_prefetch = 0 : i64, scratch_operands = 1 : i64, tpu.core_type = #tpu.core_type<tc>, window_params = [{transform_indices = @transform_0, window_bounds = array<i64: 1, 2, 32>}, {pipeline_mode = #tpu.pipeline_mode<synchronous>, transform_indices = @transform_1, window_bounds = array<i64: 32, 128>}, {pipeline_mode = #tpu.pipeline_mode<synchronous>, transform_indices = @transform_2, window_bounds = array<i64: 1, 128>}, {pipeline_mode = #tpu.pipeline_mode<synchronous>, transform_indices = @transform_3, window_bounds = array<i64: 32, 8>}, {pipeline_mode = #tpu.pipeline_mode<synchronous>, transform_indices = @transform_4, window_bounds = array<i64: 1, 8>}, {transform_indices = @transform_5, window_bounds = array<i64: 1, 16, 8>}]} {
    %c0 = arith.constant 0 : index
    %c0_0 = arith.constant 0 : index
    %0 = vector.load %arg2[%c0, %c0_0] : memref<32x128xf32, #tpu.memory_space<vmem>>, vector<32x128xf32>
    %c0_1 = arith.constant 0 : index
    %c0_2 = arith.constant 0 : index
    %1 = vector.load %arg3[%c0_1, %c0_2] : memref<1x128xf32, #tpu.memory_space<vmem>>, vector<1x128xf32>
    %c0_3 = arith.constant 0 : index
    %c0_4 = arith.constant 0 : index
    %c0_5 = arith.constant 0 : index
    %2 = vector.load %arg1[%c0_3, %c0_4, %c0_5] : memref<1x2x32xf32, #tpu.memory_space<vmem>>, vector<1x2x32xf32>
    %3 = vector.shape_cast %2 : vector<1x2x32xf32> to vector<2x32xf32>
    %c0_i32 = arith.constant 0 : i32
    %cst = arith.constant dense<0.000000e+00> : vector<2x128xf32>
    %4 = tpu.matmul %3, %0, %cst {dimension_numbers = #tpu.dot_dimension_numbers<[1], [0], [0], [1], [0, 0, 1, 1], [], []>} : vector<2x32xf32>, vector<32x128xf32>, vector<2x128xf32> -> vector<2x128xf32>
    %5 = vector.broadcast %1 : vector<1x128xf32> to vector<2x128xf32>
    %6 = arith.addf %4, %5 : vector<2x128xf32>
    %7 = vector.extract_strided_slice %6 {offsets = [0, 0], sizes = [2, 64], strides = [1, 1]} : vector<2x128xf32> to vector<2x64xf32>
    %8 = arith.negf %7 : vector<2x64xf32>
    %9 = math.exp %8 : vector<2x64xf32>
    %cst_6 = arith.constant 1.000000e+00 : f32
    %10 = vector.broadcast %cst_6 : f32 to vector<2x64xf32>
    %11 = arith.addf %10, %9 : vector<2x64xf32>
    %12 = arith.divf %10, %11 : vector<2x64xf32>
    %13 = vector.extract_strided_slice %12 {offsets = [0, 0], sizes = [2, 32], strides = [1, 1]} : vector<2x64xf32> to vector<2x32xf32>
    %14 = vector.extract_strided_slice %12 {offsets = [0, 32], sizes = [2, 32], strides = [1, 1]} : vector<2x64xf32> to vector<2x32xf32>
    %15 = vector.extract_strided_slice %6 {offsets = [0, 64], sizes = [2, 32], strides = [1, 1]} : vector<2x128xf32> to vector<2x32xf32>
    %16 = vector.extract_strided_slice %6 {offsets = [0, 96], sizes = [2, 32], strides = [1, 1]} : vector<2x128xf32> to vector<2x32xf32>
    %17 = arith.mulf %13, %16 : vector<2x32xf32>
    %18 = arith.addf %15, %17 : vector<2x32xf32>
    %19 = math.tanh %18 : vector<2x32xf32>
    %cst_7 = arith.constant 1.000000e+00 : f32
    %20 = vector.broadcast %cst_7 : f32 to vector<2x32xf32>
    %21 = arith.subf %20, %14 : vector<2x32xf32>
    %22 = arith.mulf %21, %19 : vector<2x32xf32>
    %23 = arith.mulf %14, %3 : vector<2x32xf32>
    %24 = arith.addf %22, %23 : vector<2x32xf32>
    %c2_i32 = arith.constant 2 : i32
    %25 = arith.muli %c0_i32, %c2_i32 : i32
    %26 = arith.index_cast %25 : i32 to index
    %c0_8 = arith.constant 0 : index
    %27 = vector.load %arg7[%26, %c0_8] : memref<16x32xf32, #tpu.memory_space<vmem>>, vector<2x32xf32>
    tpu.vector_store %arg7[%26, %c0_8], %24 {strides = array<i32>} : memref<16x32xf32, #tpu.memory_space<vmem>>, vector<2x32xf32>,
    %c1_i32 = arith.constant 1 : i32
    %cst_9 = arith.constant dense<0.000000e+00> : vector<2x128xf32>
    %28 = tpu.matmul %24, %0, %cst_9 {dimension_numbers = #tpu.dot_dimension_numbers<[1], [0], [0], [1], [0, 0, 1, 1], [], []>} : vector<2x32xf32>, vector<32x128xf32>, vector<2x128xf32> -> vector<2x128xf32>
    %29 = vector.broadcast %1 : vector<1x128xf32> to vector<2x128xf32>
    %30 = arith.addf %28, %29 : vector<2x128xf32>
    %31 = vector.extract_strided_slice %30 {offsets = [0, 0], sizes = [2, 64], strides = [1, 1]} : vector<2x128xf32> to vector<2x64xf32>
    %32 = arith.negf %31 : vector<2x64xf32>
    %33 = math.exp %32 : vector<2x64xf32>
    %cst_10 = arith.constant 1.000000e+00 : f32
    %34 = vector.broadcast %cst_10 : f32 to vector<2x64xf32>
    %35 = arith.addf %34, %33 : vector<2x64xf32>
    %36 = arith.divf %34, %35 : vector<2x64xf32>
    %37 = vector.extract_strided_slice %36 {offsets = [0, 0], sizes = [2, 32], strides = [1, 1]} : vector<2x64xf32> to vector<2x32xf32>
    %38 = vector.extract_strided_slice %36 {offsets = [0, 32], sizes = [2, 32], strides = [1, 1]} : vector<2x64xf32> to vector<2x32xf32>
    %39 = vector.extract_strided_slice %30 {offsets = [0, 64], sizes = [2, 32], strides = [1, 1]} : vector<2x128xf32> to vector<2x32xf32>
    %40 = vector.extract_strided_slice %30 {offsets = [0, 96], sizes = [2, 32], strides = [1, 1]} : vector<2x128xf32> to vector<2x32xf32>
    %41 = arith.mulf %37, %40 : vector<2x32xf32>
    %42 = arith.addf %39, %41 : vector<2x32xf32>
    %43 = math.tanh %42 : vector<2x32xf32>
    %cst_11 = arith.constant 1.000000e+00 : f32
    %44 = vector.broadcast %cst_11 : f32 to vector<2x32xf32>
    %45 = arith.subf %44, %38 : vector<2x32xf32>
    %46 = arith.mulf %45, %43 : vector<2x32xf32>
    %47 = arith.mulf %38, %24 : vector<2x32xf32>
    %48 = arith.addf %46, %47 : vector<2x32xf32>
    %c2_i32_12 = arith.constant 2 : i32
    %49 = arith.muli %c1_i32, %c2_i32_12 : i32
    %50 = arith.index_cast %49 : i32 to index
    %c0_13 = arith.constant 0 : index
    %51 = vector.load %arg7[%50, %c0_13] : memref<16x32xf32, #tpu.memory_space<vmem>>, vector<2x32xf32>
    tpu.vector_store %arg7[%50, %c0_13], %48 {strides = array<i32>} : memref<16x32xf32, #tpu.memory_space<vmem>>, vector<2x32xf32>,
    %c2_i32_14 = arith.constant 2 : i32
    %cst_15 = arith.constant dense<0.000000e+00> : vector<2x128xf32>
    %52 = tpu.matmul %48, %0, %cst_15 {dimension_numbers = #tpu.dot_dimension_numbers<[1], [0], [0], [1], [0, 0, 1, 1], [], []>} : vector<2x32xf32>, vector<32x128xf32>, vector<2x128xf32> -> vector<2x128xf32>
    %53 = vector.broadcast %1 : vector<1x128xf32> to vector<2x128xf32>
    %54 = arith.addf %52, %53 : vector<2x128xf32>
    %55 = vector.extract_strided_slice %54 {offsets = [0, 0], sizes = [2, 64], strides = [1, 1]} : vector<2x128xf32> to vector<2x64xf32>
    %56 = arith.negf %55 : vector<2x64xf32>
    %57 = math.exp %56 : vector<2x64xf32>
    %cst_16 = arith.constant 1.000000e+00 : f32
    %58 = vector.broadcast %cst_16 : f32 to vector<2x64xf32>
    %59 = arith.addf %58, %57 : vector<2x64xf32>
    %60 = arith.divf %58, %59 : vector<2x64xf32>
    %61 = vector.extract_strided_slice %60 {offsets = [0, 0], sizes = [2, 32], strides = [1, 1]} : vector<2x64xf32> to vector<2x32xf32>
    %62 = vector.extract_strided_slice %60 {offsets = [0, 32], sizes = [2, 32], strides = [1, 1]} : vector<2x64xf32> to vector<2x32xf32>
    %63 = vector.extract_strided_slice %54 {offsets = [0, 64], sizes = [2, 32], strides = [1, 1]} : vector<2x128xf32> to vector<2x32xf32>
    %64 = vector.extract_strided_slice %54 {offsets = [0, 96], sizes = [2, 32], strides = [1, 1]} : vector<2x128xf32> to vector<2x32xf32>
    %65 = arith.mulf %61, %64 : vector<2x32xf32>
    %66 = arith.addf %63, %65 : vector<2x32xf32>
    %67 = math.tanh %66 : vector<2x32xf32>
    %cst_17 = arith.constant 1.000000e+00 : f32
    %68 = vector.broadcast %cst_17 : f32 to vector<2x32xf32>
    %69 = arith.subf %68, %62 : vector<2x32xf32>
    %70 = arith.mulf %69, %67 : vector<2x32xf32>
    %71 = arith.mulf %62, %48 : vector<2x32xf32>
    %72 = arith.addf %70, %71 : vector<2x32xf32>
    %c2_i32_18 = arith.constant 2 : i32
    %73 = arith.muli %c2_i32_14, %c2_i32_18 : i32
    %74 = arith.index_cast %73 : i32 to index
    %c0_19 = arith.constant 0 : index
    %75 = vector.load %arg7[%74, %c0_19] : memref<16x32xf32, #tpu.memory_space<vmem>>, vector<2x32xf32>
    tpu.vector_store %arg7[%74, %c0_19], %72 {strides = array<i32>} : memref<16x32xf32, #tpu.memory_space<vmem>>, vector<2x32xf32>,
    %c3_i32 = arith.constant 3 : i32
    %cst_20 = arith.constant dense<0.000000e+00> : vector<2x128xf32>
    %76 = tpu.matmul %72, %0, %cst_20 {dimension_numbers = #tpu.dot_dimension_numbers<[1], [0], [0], [1], [0, 0, 1, 1], [], []>} : vector<2x32xf32>, vector<32x128xf32>, vector<2x128xf32> -> vector<2x128xf32>
    %77 = vector.broadcast %1 : vector<1x128xf32> to vector<2x128xf32>
    %78 = arith.addf %76, %77 : vector<2x128xf32>
    %79 = vector.extract_strided_slice %78 {offsets = [0, 0], sizes = [2, 64], strides = [1, 1]} : vector<2x128xf32> to vector<2x64xf32>
    %80 = arith.negf %79 : vector<2x64xf32>
    %81 = math.exp %80 : vector<2x64xf32>
    %cst_21 = arith.constant 1.000000e+00 : f32
    %82 = vector.broadcast %cst_21 : f32 to vector<2x64xf32>
    %83 = arith.addf %82, %81 : vector<2x64xf32>
    %84 = arith.divf %82, %83 : vector<2x64xf32>
    %85 = vector.extract_strided_slice %84 {offsets = [0, 0], sizes = [2, 32], strides = [1, 1]} : vector<2x64xf32> to vector<2x32xf32>
    %86 = vector.extract_strided_slice %84 {offsets = [0, 32], sizes = [2, 32], strides = [1, 1]} : vector<2x64xf32> to vector<2x32xf32>
    %87 = vector.extract_strided_slice %78 {offsets = [0, 64], sizes = [2, 32], strides = [1, 1]} : vector<2x128xf32> to vector<2x32xf32>
    %88 = vector.extract_strided_slice %78 {offsets = [0, 96], sizes = [2, 32], strides = [1, 1]} : vector<2x128xf32> to vector<2x32xf32>
    %89 = arith.mulf %85, %88 : vector<2x32xf32>
    %90 = arith.addf %87, %89 : vector<2x32xf32>
    %91 = math.tanh %90 : vector<2x32xf32>
    %cst_22 = arith.constant 1.000000e+00 : f32
    %92 = vector.broadcast %cst_22 : f32 to vector<2x32xf32>
    %93 = arith.subf %92, %86 : vector<2x32xf32>
    %94 = arith.mulf %93, %91 : vector<2x32xf32>
    %95 = arith.mulf %86, %72 : vector<2x32xf32>
    %96 = arith.addf %94, %95 : vector<2x32xf32>
    %c2_i32_23 = arith.constant 2 : i32
    %97 = arith.muli %c3_i32, %c2_i32_23 : i32
    %98 = arith.index_cast %97 : i32 to index
    %c0_24 = arith.constant 0 : index
    %99 = vector.load %arg7[%98, %c0_24] : memref<16x32xf32, #tpu.memory_space<vmem>>, vector<2x32xf32>
    tpu.vector_store %arg7[%98, %c0_24], %96 {strides = array<i32>} : memref<16x32xf32, #tpu.memory_space<vmem>>, vector<2x32xf32>,
    %c4_i32 = arith.constant 4 : i32
    %cst_25 = arith.constant dense<0.000000e+00> : vector<2x128xf32>
    %100 = tpu.matmul %96, %0, %cst_25 {dimension_numbers = #tpu.dot_dimension_numbers<[1], [0], [0], [1], [0, 0, 1, 1], [], []>} : vector<2x32xf32>, vector<32x128xf32>, vector<2x128xf32> -> vector<2x128xf32>
    %101 = vector.broadcast %1 : vector<1x128xf32> to vector<2x128xf32>
    %102 = arith.addf %100, %101 : vector<2x128xf32>
    %103 = vector.extract_strided_slice %102 {offsets = [0, 0], sizes = [2, 64], strides = [1, 1]} : vector<2x128xf32> to vector<2x64xf32>
    %104 = arith.negf %103 : vector<2x64xf32>
    %105 = math.exp %104 : vector<2x64xf32>
    %cst_26 = arith.constant 1.000000e+00 : f32
    %106 = vector.broadcast %cst_26 : f32 to vector<2x64xf32>
    %107 = arith.addf %106, %105 : vector<2x64xf32>
    %108 = arith.divf %106, %107 : vector<2x64xf32>
    %109 = vector.extract_strided_slice %108 {offsets = [0, 0], sizes = [2, 32], strides = [1, 1]} : vector<2x64xf32> to vector<2x32xf32>
    %110 = vector.extract_strided_slice %108 {offsets = [0, 32], sizes = [2, 32], strides = [1, 1]} : vector<2x64xf32> to vector<2x32xf32>
    %111 = vector.extract_strided_slice %102 {offsets = [0, 64], sizes = [2, 32], strides = [1, 1]} : vector<2x128xf32> to vector<2x32xf32>
    %112 = vector.extract_strided_slice %102 {offsets = [0, 96], sizes = [2, 32], strides = [1, 1]} : vector<2x128xf32> to vector<2x32xf32>
    %113 = arith.mulf %109, %112 : vector<2x32xf32>
    %114 = arith.addf %111, %113 : vector<2x32xf32>
    %115 = math.tanh %114 : vector<2x32xf32>
    %cst_27 = arith.constant 1.000000e+00 : f32
    %116 = vector.broadcast %cst_27 : f32 to vector<2x32xf32>
    %117 = arith.subf %116, %110 : vector<2x32xf32>
    %118 = arith.mulf %117, %115 : vector<2x32xf32>
    %119 = arith.mulf %110, %96 : vector<2x32xf32>
    %120 = arith.addf %118, %119 : vector<2x32xf32>
    %c2_i32_28 = arith.constant 2 : i32
    %121 = arith.muli %c4_i32, %c2_i32_28 : i32
    %122 = arith.index_cast %121 : i32 to index
    %c0_29 = arith.constant 0 : index
    %123 = vector.load %arg7[%122, %c0_29] : memref<16x32xf32, #tpu.memory_space<vmem>>, vector<2x32xf32>
    tpu.vector_store %arg7[%122, %c0_29], %120 {strides = array<i32>} : memref<16x32xf32, #tpu.memory_space<vmem>>, vector<2x32xf32>,
    %c5_i32 = arith.constant 5 : i32
    %cst_30 = arith.constant dense<0.000000e+00> : vector<2x128xf32>
    %124 = tpu.matmul %120, %0, %cst_30 {dimension_numbers = #tpu.dot_dimension_numbers<[1], [0], [0], [1], [0, 0, 1, 1], [], []>} : vector<2x32xf32>, vector<32x128xf32>, vector<2x128xf32> -> vector<2x128xf32>
    %125 = vector.broadcast %1 : vector<1x128xf32> to vector<2x128xf32>
    %126 = arith.addf %124, %125 : vector<2x128xf32>
    %127 = vector.extract_strided_slice %126 {offsets = [0, 0], sizes = [2, 64], strides = [1, 1]} : vector<2x128xf32> to vector<2x64xf32>
    %128 = arith.negf %127 : vector<2x64xf32>
    %129 = math.exp %128 : vector<2x64xf32>
    %cst_31 = arith.constant 1.000000e+00 : f32
    %130 = vector.broadcast %cst_31 : f32 to vector<2x64xf32>
    %131 = arith.addf %130, %129 : vector<2x64xf32>
    %132 = arith.divf %130, %131 : vector<2x64xf32>
    %133 = vector.extract_strided_slice %132 {offsets = [0, 0], sizes = [2, 32], strides = [1, 1]} : vector<2x64xf32> to vector<2x32xf32>
    %134 = vector.extract_strided_slice %132 {offsets = [0, 32], sizes = [2, 32], strides = [1, 1]} : vector<2x64xf32> to vector<2x32xf32>
    %135 = vector.extract_strided_slice %126 {offsets = [0, 64], sizes = [2, 32], strides = [1, 1]} : vector<2x128xf32> to vector<2x32xf32>
    %136 = vector.extract_strided_slice %126 {offsets = [0, 96], sizes = [2, 32], strides = [1, 1]} : vector<2x128xf32> to vector<2x32xf32>
    %137 = arith.mulf %133, %136 : vector<2x32xf32>
    %138 = arith.addf %135, %137 : vector<2x32xf32>
    %139 = math.tanh %138 : vector<2x32xf32>
    %cst_32 = arith.constant 1.000000e+00 : f32
    %140 = vector.broadcast %cst_32 : f32 to vector<2x32xf32>
    %141 = arith.subf %140, %134 : vector<2x32xf32>
    %142 = arith.mulf %141, %139 : vector<2x32xf32>
    %143 = arith.mulf %134, %120 : vector<2x32xf32>
    %144 = arith.addf %142, %143 : vector<2x32xf32>
    %c2_i32_33 = arith.constant 2 : i32
    %145 = arith.muli %c5_i32, %c2_i32_33 : i32
    %146 = arith.index_cast %145 : i32 to index
    %c0_34 = arith.constant 0 : index
    %147 = vector.load %arg7[%146, %c0_34] : memref<16x32xf32, #tpu.memory_space<vmem>>, vector<2x32xf32>
    tpu.vector_store %arg7[%146, %c0_34], %144 {strides = array<i32>} : memref<16x32xf32, #tpu.memory_space<vmem>>, vector<2x32xf32>,
    %c6_i32 = arith.constant 6 : i32
    %cst_35 = arith.constant dense<0.000000e+00> : vector<2x128xf32>
    %148 = tpu.matmul %144, %0, %cst_35 {dimension_numbers = #tpu.dot_dimension_numbers<[1], [0], [0], [1], [0, 0, 1, 1], [], []>} : vector<2x32xf32>, vector<32x128xf32>, vector<2x128xf32> -> vector<2x128xf32>
    %149 = vector.broadcast %1 : vector<1x128xf32> to vector<2x128xf32>
    %150 = arith.addf %148, %149 : vector<2x128xf32>
    %151 = vector.extract_strided_slice %150 {offsets = [0, 0], sizes = [2, 64], strides = [1, 1]} : vector<2x128xf32> to vector<2x64xf32>
    %152 = arith.negf %151 : vector<2x64xf32>
    %153 = math.exp %152 : vector<2x64xf32>
    %cst_36 = arith.constant 1.000000e+00 : f32
    %154 = vector.broadcast %cst_36 : f32 to vector<2x64xf32>
    %155 = arith.addf %154, %153 : vector<2x64xf32>
    %156 = arith.divf %154, %155 : vector<2x64xf32>
    %157 = vector.extract_strided_slice %156 {offsets = [0, 0], sizes = [2, 32], strides = [1, 1]} : vector<2x64xf32> to vector<2x32xf32>
    %158 = vector.extract_strided_slice %156 {offsets = [0, 32], sizes = [2, 32], strides = [1, 1]} : vector<2x64xf32> to vector<2x32xf32>
    %159 = vector.extract_strided_slice %150 {offsets = [0, 64], sizes = [2, 32], strides = [1, 1]} : vector<2x128xf32> to vector<2x32xf32>
    %160 = vector.extract_strided_slice %150 {offsets = [0, 96], sizes = [2, 32], strides = [1, 1]} : vector<2x128xf32> to vector<2x32xf32>
    %161 = arith.mulf %157, %160 : vector<2x32xf32>
    %162 = arith.addf %159, %161 : vector<2x32xf32>
    %163 = math.tanh %162 : vector<2x32xf32>
    %cst_37 = arith.constant 1.000000e+00 : f32
    %164 = vector.broadcast %cst_37 : f32 to vector<2x32xf32>
    %165 = arith.subf %164, %158 : vector<2x32xf32>
    %166 = arith.mulf %165, %163 : vector<2x32xf32>
    %167 = arith.mulf %158, %144 : vector<2x32xf32>
    %168 = arith.addf %166, %167 : vector<2x32xf32>
    %c2_i32_38 = arith.constant 2 : i32
    %169 = arith.muli %c6_i32, %c2_i32_38 : i32
    %170 = arith.index_cast %169 : i32 to index
    %c0_39 = arith.constant 0 : index
    %171 = vector.load %arg7[%170, %c0_39] : memref<16x32xf32, #tpu.memory_space<vmem>>, vector<2x32xf32>
    tpu.vector_store %arg7[%170, %c0_39], %168 {strides = array<i32>} : memref<16x32xf32, #tpu.memory_space<vmem>>, vector<2x32xf32>,
    %c7_i32 = arith.constant 7 : i32
    %cst_40 = arith.constant dense<0.000000e+00> : vector<2x128xf32>
    %172 = tpu.matmul %168, %0, %cst_40 {dimension_numbers = #tpu.dot_dimension_numbers<[1], [0], [0], [1], [0, 0, 1, 1], [], []>} : vector<2x32xf32>, vector<32x128xf32>, vector<2x128xf32> -> vector<2x128xf32>
    %173 = vector.broadcast %1 : vector<1x128xf32> to vector<2x128xf32>
    %174 = arith.addf %172, %173 : vector<2x128xf32>
    %175 = vector.extract_strided_slice %174 {offsets = [0, 0], sizes = [2, 64], strides = [1, 1]} : vector<2x128xf32> to vector<2x64xf32>
    %176 = arith.negf %175 : vector<2x64xf32>
    %177 = math.exp %176 : vector<2x64xf32>
    %cst_41 = arith.constant 1.000000e+00 : f32
    %178 = vector.broadcast %cst_41 : f32 to vector<2x64xf32>
    %179 = arith.addf %178, %177 : vector<2x64xf32>
    %180 = arith.divf %178, %179 : vector<2x64xf32>
    %181 = vector.extract_strided_slice %180 {offsets = [0, 0], sizes = [2, 32], strides = [1, 1]} : vector<2x64xf32> to vector<2x32xf32>
    %182 = vector.extract_strided_slice %180 {offsets = [0, 32], sizes = [2, 32], strides = [1, 1]} : vector<2x64xf32> to vector<2x32xf32>
    %183 = vector.extract_strided_slice %174 {offsets = [0, 64], sizes = [2, 32], strides = [1, 1]} : vector<2x128xf32> to vector<2x32xf32>
    %184 = vector.extract_strided_slice %174 {offsets = [0, 96], sizes = [2, 32], strides = [1, 1]} : vector<2x128xf32> to vector<2x32xf32>
    %185 = arith.mulf %181, %184 : vector<2x32xf32>
    %186 = arith.addf %183, %185 : vector<2x32xf32>
    %187 = math.tanh %186 : vector<2x32xf32>
    %cst_42 = arith.constant 1.000000e+00 : f32
    %188 = vector.broadcast %cst_42 : f32 to vector<2x32xf32>
    %189 = arith.subf %188, %182 : vector<2x32xf32>
    %190 = arith.mulf %189, %187 : vector<2x32xf32>
    %191 = arith.mulf %182, %168 : vector<2x32xf32>
    %192 = arith.addf %190, %191 : vector<2x32xf32>
    %c2_i32_43 = arith.constant 2 : i32
    %193 = arith.muli %c7_i32, %c2_i32_43 : i32
    %194 = arith.index_cast %193 : i32 to index
    %c0_44 = arith.constant 0 : index
    %195 = vector.load %arg7[%194, %c0_44] : memref<16x32xf32, #tpu.memory_space<vmem>>, vector<2x32xf32>
    tpu.vector_store %arg7[%194, %c0_44], %192 {strides = array<i32>} : memref<16x32xf32, #tpu.memory_space<vmem>>, vector<2x32xf32>,
    %c8_i32 = arith.constant 8 : i32
    %c0_45 = arith.constant 0 : index
    %c0_46 = arith.constant 0 : index
    %196 = vector.load %arg7[%c0_45, %c0_46] : memref<16x32xf32, #tpu.memory_space<vmem>>, vector<16x32xf32>
    %c0_47 = arith.constant 0 : index
    %c0_48 = arith.constant 0 : index
    %197 = vector.load %arg4[%c0_47, %c0_48] : memref<32x8xf32, #tpu.memory_space<vmem>>, vector<32x8xf32>
    %cst_49 = arith.constant dense<0.000000e+00> : vector<16x8xf32>
    %198 = tpu.matmul %196, %197, %cst_49 {dimension_numbers = #tpu.dot_dimension_numbers<[1], [0], [0], [1], [0, 0, 1, 1], [], []>} : vector<16x32xf32>, vector<32x8xf32>, vector<16x8xf32> -> vector<16x8xf32>
    %c0_50 = arith.constant 0 : index
    %c0_51 = arith.constant 0 : index
    %199 = vector.load %arg5[%c0_50, %c0_51] : memref<1x8xf32, #tpu.memory_space<vmem>>, vector<1x8xf32>
    %200 = vector.broadcast %199 : vector<1x8xf32> to vector<16x8xf32>
    %201 = arith.addf %198, %200 : vector<16x8xf32>
    %c0_52 = arith.constant 0 : index
    %c0_53 = arith.constant 0 : index
    %c0_54 = arith.constant 0 : index
    %202 = vector.load %arg6[%c0_52, %c0_53, %c0_54] : memref<1x16x8xf32, #tpu.memory_space<vmem>>, vector<1x16x8xf32>
    %203 = vector.shape_cast %202 : vector<1x16x8xf32> to vector<16x8xf32>
    %204 = vector.shape_cast %201 : vector<16x8xf32> to vector<1x16x8xf32>
    tpu.vector_store %arg6[%c0_52, %c0_53, %c0_54], %204 {strides = array<i32>} : memref<1x16x8xf32, #tpu.memory_space<vmem>>, vector<1x16x8xf32>,
    return
  }
  func.func @transform_0(%arg0: i32) -> (i32, i32, i32) {
    %c0_i32 = arith.constant 0 : i32
    %c0_i32_0 = arith.constant 0 : i32
    %c0_i32_1 = arith.constant 0 : i32
    return %arg0, %c0_i32, %c0_i32_0 : i32, i32, i32
  }
  func.func @transform_1(%arg0: i32) -> (i32, i32) {
    %c0_i32 = arith.constant 0 : i32
    %c0_i32_0 = arith.constant 0 : i32
    %c0_i32_1 = arith.constant 0 : i32
    return %c0_i32, %c0_i32_0 : i32, i32
  }
  func.func @transform_2(%arg0: i32) -> (i32, i32) {
    %c0_i32 = arith.constant 0 : i32
    %c0_i32_0 = arith.constant 0 : i32
    %c0_i32_1 = arith.constant 0 : i32
    return %c0_i32, %c0_i32_0 : i32, i32
  }
  func.func @transform_3(%arg0: i32) -> (i32, i32) {
    %c0_i32 = arith.constant 0 : i32
    %c0_i32_0 = arith.constant 0 : i32
    %c0_i32_1 = arith.constant 0 : i32
    return %c0_i32, %c0_i32_0 : i32, i32
  }
  func.func @transform_4(%arg0: i32) -> (i32, i32) {
    %c0_i32 = arith.constant 0 : i32
    %c0_i32_0 = arith.constant 0 : i32
    %c0_i32_1 = arith.constant 0 : i32
    return %c0_i32, %c0_i32_0 : i32, i32
  }
  func.func @transform_5(%arg0: i32) -> (i32, i32, i32) {
    %c0_i32 = arith.constant 0 : i32
    %c0_i32_0 = arith.constant 0 : i32
    %c0_i32_1 = arith.constant 0 : i32
    return %arg0, %c0_i32, %c0_i32_0 : i32, i32, i32
  }
}

</mosaic_0001>

<bundles_post_ra>
// kernel: tpu_custom_call.1
= control target key start
LH: loop header
LB: loop body
LE: loop exit
PB: predicated region body
PF: predicated region fallthrough
CT: control target
= control target key end

     0   :  { %vm29_vm0 = vcmask 261120   ;;  %s672_s28 = smov 32   ;;  %s674_s29 = smov 96   ;;  %vm98_vm5 = vcmask 254976   ;;  %s811_s1 = inlined_call_operand.vmem [shape: f32[32,128], index: 1, kind: input, shape index: {}]   ;;  %s812_s2 = inlined_call_operand.vmem [shape: f32[1,128], index: 2, kind: input, shape index: {}]   ;;  %s813_s0 = inlined_call_operand.vmem [shape: f32[1,2,32], index: 0, kind: input, shape index: {}]   ;;  %s814_s3 = inlined_call_operand.vmem [shape: f32[32,8], index: 3, kind: input, shape index: {}]   ;;  %s815_s4 = inlined_call_operand.vmem [shape: f32[1,8], index: 4, kind: input, shape index: {}]   ;;  %s816_s5 = inlined_call_operand.vmem [shape: f32[1,16,8], index: 5, kind: output, shape index: {}]  }
   0x1   :  { %v23_v0 = vld [vmem:[%s811_s1 + $0x18] sm:$0xff]  ;;  %v22_v1 = vld [vmem:[%s811_s1 + $0x10] sm:$0xff]  ;;  %v21_v2 = vld [vmem:[%s811_s1 + $0x8] sm:$0xff] }
   0x2   :  { %45 = vmatpush.msra.mxu1 %v23_v0  ;;  %179 = vmatpush.msra.mxu2 %v23_v0  ;;  %v20_v3 = vld [vmem:[%s811_s1] sm:$0xff] }
   0x3   :  { %244 = vmatpush.msra.mxu3 %v23_v0  ;;  %309 = vmatpush.msra.mxu0 %v23_v0  ;;  %v25_v4 = vld [vmem:[%s813_s0] sm:$0x3] }
   0x4   :  { %46 = vmatpush.msra.mxu1 %v22_v1  ;;  %180 = vmatpush.msra.mxu2 %v22_v1  ;;  %v724_v5 = vld [vmem:[%s812_s2] ss:$0 sm:$0xff]  ;;  %s673_s2 = smov 64  }
   0x5   :  { %245 = vmatpush.msra.mxu3 %v22_v1  ;;  %310 = vmatpush.msra.mxu0 %v22_v1 }
   0x6   :  { %47 = vmatpush.msra.mxu1 %v21_v2  ;;  %181 = vmatpush.msra.mxu2 %v21_v2 }
   0x7   :  { %246 = vmatpush.msra.mxu3 %v21_v2  ;;  %311 = vmatpush.msra.mxu0 %v21_v2 }
   0x8   :  { %48 = vmatpush.msra.mxu1 %v20_v3  ;;  %182 = vmatpush.msra.mxu2 %v20_v3 }
   0x9   :  { %601 = vmatmul.msk.f32.vlgmr.msra.gmra.mxu1 %vm29_vm0, %v25_v4  ;;  %247 = vmatpush.msra.mxu3 %v20_v3 }
   0xa   :  { %114 = vmatpush.msrb.mxu1 %v23_v0  ;;  %312 = vmatpush.msra.mxu0 %v20_v3 }
   0xb   :  { %439 = vmatpush.msrb.mxu2 %v23_v0  ;;  %504 = vmatpush.msrb.mxu3 %v23_v0 }
   0xc   :  { %115 = vmatpush.msrb.mxu1 %v22_v1 }
   0xd   :  { %440 = vmatpush.msrb.mxu2 %v22_v1  ;;  %505 = vmatpush.msrb.mxu3 %v22_v1 }
   0xe   :  { %116 = vmatpush.msrb.mxu1 %v21_v2 }
   0xf   :  { %441 = vmatpush.msrb.mxu2 %v21_v2  ;;  %506 = vmatpush.msrb.mxu3 %v21_v2 }
  0x10   :  { %117 = vmatpush.msrb.mxu1 %v20_v3 }
  0x11   :  { %442 = vmatpush.msrb.mxu2 %v20_v3  ;;  %507 = vmatpush.msrb.mxu3 %v20_v3 }
  0x12   :  { %374 = vmatpush.msra.mxu1 %v23_v0 }
  0x14   :  { %375 = vmatpush.msra.mxu1 %v22_v1 }
  0x16   :  { %376 = vmatpush.msra.mxu1 %v21_v2 }
  0x18   :  { %377 = vmatpush.msra.mxu1 %v20_v3 }
  0x86   :  { %v50_v6 = vpop.f32.mrf.mxu1 }
  0x87   :  { %v51_v7 = vadd.f32 %v724_v5, %v50_v6 }
  0x89   :  { %73 = vrot.lane.b32.xlu0 %v51_v7, %s672_s28  ;;  %v602_v8 = vmul.f32 -1.442695, %v51_v7 }
  0x8b   :  { %624 = vpow2.f32 %v602_v8 }
  0x91   :  { %v625_v9 = vpop.eup %624 }
  0x92   :  { %v56_v10 = vadd.f32 1.0, %v625_v9 }
  0x94   :  { %626 = vrcp.f32 %v56_v10  ;;  %v68_v16 = vand.u32 2147483648, %v56_v10  ;;  %vm62_vm2 = vweird.f32 %v56_v10  ;;  %v66_v17 = vand.u32 2147483647, %v56_v10 }
  0x96   :  { %v69_v19 = vor.u32 1.1754944e-38, %v68_v16  ;;  %vm67_vm4 = vcmp.eq.f32.partialorder %v66_v17, 8.507059e+37 }
  0x9a   :  { %v627_v11 = vpop.eup %626 }
  0x9b   :  { %v58_v12 = vmul.f32 %v627_v11, %v56_v10  ;;  %vm63_vm1 = vweird.f32 %v627_v11 }
  0x9c   :  { %vm64_vm3 = vmor %vm62_vm2, %vm63_vm1 }
  0x9d   :  { %v59_v13 = vsub.f32 1.0, %v58_v12 }
  0x9f   :  { %v60_v14 = vmul.f32 %v627_v11, %v59_v13 }
  0xa1   :  { %v61_v15 = vadd.f32 %v627_v11, %v60_v14 }
  0xa3   :  { %v65_v18 = vsel %vm64_vm3, %v627_v11, %v61_v15  ;;  %vm594_vm3 = vcmask 64512  }
  0xa4   :  { %v70_v21 = vsel %vm67_vm4, %v69_v19, %v65_v18 }
  0xa5   :  { %v83_v27 = vsub.f32 1.0, %v70_v21 }
  0xfb   :  { %v74_v20 = vpop.permute.xlu0 %73 }
  0xfc   :  { %v76_v22 = vmul.f32 %v74_v20, %v70_v21 }
  0xfe   :  { %78 = vrot.lane.b32.xlu0 %v76_v22, %s673_s2 }
 0x170   :  { %v79_v23 = vpop.permute.xlu0 %78 }
 0x171   :  { %v81_v24 = vadd.f32 %v79_v23, %v51_v7 }
 0x173   :  { %628 = vtanh.f32 %v81_v24 }
 0x179   :  { %v629_v25 = vpop.eup %628 }
 0x17a   :  { %85 = vrot.lane.b32.xlu1 %v629_v25, %s674_s29 }
 0x182   :  { %89 = vrot.lane.b32.xlu1 %v25_v4, %s672_s28 }
 0x1ec   :  { %v86_v26 = vpop.permute.xlu1 %85 }
 0x1ed   :  { %v88_v29 = vmul.f32 %v86_v26, %v83_v27 }
 0x1f4   :  { %v90_v28 = vpop.permute.xlu1 %89 }
 0x1f5   :  { %v92_v30 = vmul.f32 %v90_v28, %v70_v21 }
 0x1f7   :  { %v93_v31 = vadd.f32 %v92_v30, %v88_v29 }
 0x1f9   :  { %95 = vrot.lane.b32.xlu2 %v93_v31, %s674_s29 }
 0x253   :  { %v96_v32 = vpop.permute.xlu2 %95 }
 0x254   :  { %99 = vst.msk [vmem:[#allocation2] sm:$0x3] %vm98_vm5, %v96_v32  ;;  %603 = vmatmul.msk.f32.vlgmr.msrb.gmra.mxu1 %vm29_vm0, %v96_v32 }
 0x2d1   :  { %v119_v33 = vpop.f32.mrf.mxu1 }
 0x2d2   :  { %v120_v34 = vadd.f32 %v724_v5, %v119_v33 }
 0x2d4   :  { %142 = vrot.lane.b32.xlu2 %v120_v34, %s672_s28  ;;  %v604_v35 = vmul.f32 -1.442695, %v120_v34 }
 0x2d6   :  { %630 = vpow2.f32 %v604_v35 }
 0x2dc   :  { %v631_v36 = vpop.eup %630 }
 0x2dd   :  { %v125_v37 = vadd.f32 1.0, %v631_v36 }
 0x2df   :  { %632 = vrcp.f32 %v125_v37  ;;  %v137_v43 = vand.u32 2147483648, %v125_v37  ;;  %vm131_vm7 = vweird.f32 %v125_v37  ;;  %v135_v44 = vand.u32 2147483647, %v125_v37 }
 0x2e1   :  { %v138_v46 = vor.u32 1.1754944e-38, %v137_v43  ;;  %vm136_vm9 = vcmp.eq.f32.partialorder %v135_v44, 8.507059e+37 }
 0x2e5   :  { %v633_v38 = vpop.eup %632 }
 0x2e6   :  { %v127_v39 = vmul.f32 %v633_v38, %v125_v37  ;;  %vm132_vm6 = vweird.f32 %v633_v38 }
 0x2e7   :  { %vm133_vm8 = vmor %vm131_vm7, %vm132_vm6 }
 0x2e8   :  { %v128_v40 = vsub.f32 1.0, %v127_v39 }
 0x2ea   :  { %v129_v41 = vmul.f32 %v633_v38, %v128_v40 }
 0x2ec   :  { %v130_v42 = vadd.f32 %v633_v38, %v129_v41 }
 0x2ee   :  { %v134_v45 = vsel %vm133_vm8, %v633_v38, %v130_v42 }
 0x2ef   :  { %v139_v48 = vsel %vm136_vm9, %v138_v46, %v134_v45 }
 0x2f0   :  { %v152_v53 = vsub.f32 1.0, %v139_v48  ;;  %v158_v55 = vmul.f32 %v139_v48, %v93_v31 }
 0x32e   :  { %v143_v47 = vpop.permute.xlu2 %142 }
 0x32f   :  { %v145_v49 = vmul.f32 %v143_v47, %v139_v48  ;;  %v560_v47 = vld [vmem:[%s814_s3 + $0x18] sm:$0xff]  ;;  %v559_v48 = vld [vmem:[%s814_s3 + $0x10] sm:$0xff] }
 0x330   :  { %583 = vmatpush.msrb.mxu0 %v560_v47 }
 0x331   :  { %147 = vrot.lane.b32.xlu0 %v145_v49, %s673_s2  ;;  %v558_v49 = vld [vmem:[%s814_s3 + $0x8] sm:$0xff] }
 0x332   :  { %584 = vmatpush.msrb.mxu0 %v559_v48 }
 0x334   :  { %585 = vmatpush.msrb.mxu0 %v558_v49 }
 0x3a3   :  { %v148_v50 = vpop.permute.xlu0 %147 }
 0x3a4   :  { %v150_v51 = vadd.f32 %v148_v50, %v120_v34  ;;  %v557_v50 = vld [vmem:[%s814_s3] sm:$0xff] }
 0x3a5   :  { %586 = vmatpush.msrb.mxu0 %v557_v50 }
 0x3a6   :  { %634 = vtanh.f32 %v150_v51 }
 0x3ac   :  { %v635_v52 = vpop.eup %634 }
 0x3ad   :  { %154 = vrot.lane.b32.xlu1 %v635_v52, %s674_s29 }
 0x41f   :  { %v155_v54 = vpop.permute.xlu1 %154 }
 0x420   :  { %v157_v56 = vmul.f32 %v155_v54, %v152_v53 }
 0x422   :  { %v159_v57 = vadd.f32 %v158_v55, %v157_v56  ;;  %v773_v55 = vld [vmem:[%s815_s4] ss:$0 sm:$0xff] }
 0x424   :  { %161 = vrot.lane.b32.xlu2 %v159_v57, %s674_s29 }
 0x47e   :  { %v162_v58 = vpop.permute.xlu2 %161 }
 0x47f   :  { %164 = vst.msk [vmem:[#allocation2 + $0x2] sm:$0x3] %vm98_vm5, %v162_v58  ;;  %605 = vmatmul.msk.f32.vlgmr.msra.gmra.mxu2 %vm29_vm0, %v162_v58 }
 0x502   :  { %v184_v59 = vpop.f32.mrf.mxu2 }
 0x503   :  { %v185_v60 = vadd.f32 %v724_v5, %v184_v59 }
 0x505   :  { %207 = vrot.lane.b32.xlu0 %v185_v60, %s672_s28  ;;  %v606_v61 = vmul.f32 -1.442695, %v185_v60 }
 0x507   :  { %636 = vpow2.f32 %v606_v61 }
 0x50d   :  { %v637_v62 = vpop.eup %636 }
 0x50e   :  { %v190_v63 = vadd.f32 1.0, %v637_v62 }
 0x510   :  { %638 = vrcp.f32 %v190_v63  ;;  %v202_v6 = vand.u32 2147483648, %v190_v63  ;;  %vm196_vm11 = vweird.f32 %v190_v63  ;;  %v200_v7 = vand.u32 2147483647, %v190_v63 }
 0x512   :  { %v203_v9 = vor.u32 1.1754944e-38, %v202_v6  ;;  %vm201_vm13 = vcmp.eq.f32.partialorder %v200_v7, 8.507059e+37 }
 0x516   :  { %v639_v0 = vpop.eup %638 }
 0x517   :  { %v192_v1 = vmul.f32 %v639_v0, %v190_v63  ;;  %vm197_vm10 = vweird.f32 %v639_v0 }
 0x518   :  { %vm198_vm12 = vmor %vm196_vm11, %vm197_vm10 }
 0x519   :  { %v193_v2 = vsub.f32 1.0, %v192_v1 }
 0x51b   :  { %v194_v3 = vmul.f32 %v639_v0, %v193_v2 }
 0x51d   :  { %v195_v4 = vadd.f32 %v639_v0, %v194_v3 }
 0x51f   :  { %v199_v8 = vsel %vm198_vm12, %v639_v0, %v195_v4 }
 0x520   :  { %v204_v11 = vsel %vm201_vm13, %v203_v9, %v199_v8 }
 0x521   :  { %v217_v16 = vsub.f32 1.0, %v204_v11  ;;  %v223_v18 = vmul.f32 %v204_v11, %v159_v57 }
 0x577   :  { %v208_v10 = vpop.permute.xlu0 %207 }
 0x578   :  { %v210_v12 = vmul.f32 %v208_v10, %v204_v11 }
 0x57a   :  { %212 = vrot.lane.b32.xlu1 %v210_v12, %s673_s2 }
 0x5ec   :  { %v213_v13 = vpop.permute.xlu1 %212 }
 0x5ed   :  { %v215_v14 = vadd.f32 %v213_v13, %v185_v60 }
 0x5ef   :  { %640 = vtanh.f32 %v215_v14 }
 0x5f5   :  { %v641_v15 = vpop.eup %640 }
 0x5f6   :  { %219 = vrot.lane.b32.xlu2 %v641_v15, %s674_s29 }
 0x650   :  { %v220_v17 = vpop.permute.xlu2 %219 }
 0x651   :  { %v222_v19 = vmul.f32 %v220_v17, %v217_v16 }
 0x653   :  { %v224_v20 = vadd.f32 %v223_v18, %v222_v19 }
 0x655   :  { %226 = vrot.lane.b32.xlu0 %v224_v20, %s674_s29 }
 0x6c7   :  { %v227_v21 = vpop.permute.xlu0 %226 }
 0x6c8   :  { %229 = vst.msk [vmem:[#allocation2 + $0x4] sm:$0x3] %vm98_vm5, %v227_v21  ;;  %607 = vmatmul.msk.f32.vlgmr.msra.gmra.mxu3 %vm29_vm0, %v227_v21 }
 0x74b   :  { %v249_v22 = vpop.f32.mrf.mxu3 }
 0x74c   :  { %v250_v23 = vadd.f32 %v724_v5, %v249_v22 }
 0x74e   :  { %272 = vrot.lane.b32.xlu1 %v250_v23, %s672_s28  ;;  %v608_v24 = vmul.f32 -1.442695, %v250_v23 }
 0x750   :  { %642 = vpow2.f32 %v608_v24 }
 0x756   :  { %v643_v25 = vpop.eup %642 }
 0x757   :  { %v255_v26 = vadd.f32 1.0, %v643_v25 }
 0x759   :  { %644 = vrcp.f32 %v255_v26  ;;  %v267_v32 = vand.u32 2147483648, %v255_v26  ;;  %vm261_vm15 = vweird.f32 %v255_v26  ;;  %v265_v33 = vand.u32 2147483647, %v255_v26 }
 0x75b   :  { %v268_v35 = vor.u32 1.1754944e-38, %v267_v32  ;;  %vm266_vm2 = vcmp.eq.f32.partialorder %v265_v33, 8.507059e+37 }
 0x75f   :  { %v645_v27 = vpop.eup %644 }
 0x760   :  { %v257_v28 = vmul.f32 %v645_v27, %v255_v26  ;;  %vm262_vm14 = vweird.f32 %v645_v27 }
 0x761   :  { %vm263_vm1 = vmor %vm261_vm15, %vm262_vm14 }
 0x762   :  { %v258_v29 = vsub.f32 1.0, %v257_v28 }
 0x764   :  { %v259_v30 = vmul.f32 %v645_v27, %v258_v29 }
 0x766   :  { %v260_v31 = vadd.f32 %v645_v27, %v259_v30 }
 0x768   :  { %v264_v34 = vsel %vm263_vm1, %v645_v27, %v260_v31 }
 0x769   :  { %v269_v37 = vsel %vm266_vm2, %v268_v35, %v264_v34 }
 0x76a   :  { %v282_v42 = vsub.f32 1.0, %v269_v37  ;;  %v288_v44 = vmul.f32 %v269_v37, %v224_v20 }
 0x7c0   :  { %v273_v36 = vpop.permute.xlu1 %272 }
 0x7c1   :  { %v275_v38 = vmul.f32 %v273_v36, %v269_v37 }
 0x7c3   :  { %277 = vrot.lane.b32.xlu2 %v275_v38, %s673_s2 }
 0x81d   :  { %v278_v39 = vpop.permute.xlu2 %277 }
 0x81e   :  { %v280_v40 = vadd.f32 %v278_v39, %v250_v23 }
 0x820   :  { %646 = vtanh.f32 %v280_v40 }
 0x826   :  { %v647_v41 = vpop.eup %646 }
 0x827   :  { %284 = vrot.lane.b32.xlu0 %v647_v41, %s674_s29 }
 0x899   :  { %v285_v43 = vpop.permute.xlu0 %284 }
 0x89a   :  { %v287_v45 = vmul.f32 %v285_v43, %v282_v42 }
 0x89c   :  { %v289_v46 = vadd.f32 %v288_v44, %v287_v45 }
 0x89e   :  { %291 = vrot.lane.b32.xlu1 %v289_v46, %s674_s29 }
 0x910   :  { %v292_v51 = vpop.permute.xlu1 %291 }
 0x911   :  { %294 = vst.msk [vmem:[#allocation2 + $0x6] sm:$0x3] %vm98_vm5, %v292_v51  ;;  %609 = vmatmul.msk.f32.vlgmr.msra.gmra.mxu0 %vm29_vm0, %v292_v51 }
 0x918   :  { %v555_v52 = vld [vmem:[#allocation2] sm:$0xff] }
 0x919   :  { %617 = vmatmul.msk.f32.vlgmr.msrb.gmra.mxu0 %vm29_vm0, %v555_v52 }
 0x98e   :  { %v314_v53 = vpop.f32.mrf.mxu0 }
 0x98f   :  { %v315_v54 = vadd.f32 %v724_v5, %v314_v53 }
 0x991   :  { %337 = vrot.lane.b32.xlu2 %v315_v54, %s672_s28  ;;  %v610_v58 = vmul.f32 -1.442695, %v315_v54 }
 0x993   :  { %648 = vpow2.f32 %v610_v58 }
 0x996   :  { %v588_v56 = vpop.f32.mrf.mxu0 }
 0x997   :  { %v589_v57 = vadd.f32 %v773_v55, %v588_v56 }
 0x999   :  { %595 = vst.msk [vmem:[%s816_s5] sm:$0xff] %vm594_vm3, %v589_v57  ;;  %v649_v59 = vpop.eup %648 }
 0x99a   :  { %v320_v60 = vadd.f32 1.0, %v649_v59 }
 0x99c   :  { %650 = vrcp.f32 %v320_v60  ;;  %v332_v2 = vand.u32 2147483648, %v320_v60  ;;  %vm326_vm6 = vweird.f32 %v320_v60  ;;  %v330_v3 = vand.u32 2147483647, %v320_v60 }
 0x99e   :  { %v333_v6 = vor.u32 1.1754944e-38, %v332_v2  ;;  %vm331_vm8 = vcmp.eq.f32.partialorder %v330_v3, 8.507059e+37 }
 0x9a2   :  { %v651_v61 = vpop.eup %650 }
 0x9a3   :  { %v322_v62 = vmul.f32 %v651_v61, %v320_v60  ;;  %vm327_vm4 = vweird.f32 %v651_v61 }
 0x9a4   :  { %vm328_vm7 = vmor %vm326_vm6, %vm327_vm4 }
 0x9a5   :  { %v323_v63 = vsub.f32 1.0, %v322_v62 }
 0x9a7   :  { %v324_v0 = vmul.f32 %v651_v61, %v323_v63 }
 0x9a9   :  { %v325_v1 = vadd.f32 %v651_v61, %v324_v0 }
 0x9ab   :  { %v329_v4 = vsel %vm328_vm7, %v651_v61, %v325_v1 }
 0x9ac   :  { %v334_v8 = vsel %vm331_vm8, %v333_v6, %v329_v4 }
 0x9ad   :  { %v347_v13 = vsub.f32 1.0, %v334_v8  ;;  %v353_v15 = vmul.f32 %v334_v8, %v289_v46 }
 0x9eb   :  { %v338_v7 = vpop.permute.xlu2 %337 }
 0x9ec   :  { %v340_v9 = vmul.f32 %v338_v7, %v334_v8 }
 0x9ee   :  { %342 = vrot.lane.b32.xlu0 %v340_v9, %s673_s2 }
 0xa60   :  { %v343_v10 = vpop.permute.xlu0 %342 }
 0xa61   :  { %v345_v11 = vadd.f32 %v343_v10, %v315_v54 }
 0xa63   :  { %652 = vtanh.f32 %v345_v11 }
 0xa69   :  { %v653_v12 = vpop.eup %652 }
 0xa6a   :  { %349 = vrot.lane.b32.xlu1 %v653_v12, %s674_s29 }
 0xadc   :  { %v350_v14 = vpop.permute.xlu1 %349 }
 0xadd   :  { %v352_v16 = vmul.f32 %v350_v14, %v347_v13 }
 0xadf   :  { %v354_v17 = vadd.f32 %v353_v15, %v352_v16 }
 0xae1   :  { %356 = vrot.lane.b32.xlu2 %v354_v17, %s674_s29 }
 0xb3b   :  { %v357_v18 = vpop.permute.xlu2 %356 }
 0xb3c   :  { %359 = vst.msk [vmem:[#allocation2 + $0x8] sm:$0x3] %vm98_vm5, %v357_v18  ;;  %611 = vmatmul.msk.f32.vlgmr.msra.gmra.mxu1 %vm29_vm0, %v357_v18 }
 0xbb9   :  { %v379_v19 = vpop.f32.mrf.mxu1 }
 0xbba   :  { %v380_v20 = vadd.f32 %v724_v5, %v379_v19 }
 0xbbc   :  { %402 = vrot.lane.b32.xlu0 %v380_v20, %s672_s28  ;;  %v612_v21 = vmul.f32 -1.442695, %v380_v20 }
 0xbbe   :  { %654 = vpow2.f32 %v612_v21 }
 0xbc4   :  { %v655_v22 = vpop.eup %654 }
 0xbc5   :  { %v385_v23 = vadd.f32 1.0, %v655_v22 }
 0xbc7   :  { %656 = vrcp.f32 %v385_v23  ;;  %v397_v29 = vand.u32 2147483648, %v385_v23  ;;  %vm391_vm10 = vweird.f32 %v385_v23  ;;  %v395_v30 = vand.u32 2147483647, %v385_v23 }
 0xbc9   :  { %v398_v32 = vor.u32 1.1754944e-38, %v397_v29  ;;  %vm396_vm12 = vcmp.eq.f32.partialorder %v395_v30, 8.507059e+37 }
 0xbcd   :  { %v657_v24 = vpop.eup %656 }
 0xbce   :  { %v387_v25 = vmul.f32 %v657_v24, %v385_v23  ;;  %vm392_vm9 = vweird.f32 %v657_v24 }
 0xbcf   :  { %vm393_vm11 = vmor %vm391_vm10, %vm392_vm9 }
 0xbd0   :  { %v388_v26 = vsub.f32 1.0, %v387_v25 }
 0xbd2   :  { %v389_v27 = vmul.f32 %v657_v24, %v388_v26 }
 0xbd4   :  { %v390_v28 = vadd.f32 %v657_v24, %v389_v27 }
 0xbd6   :  { %v394_v31 = vsel %vm393_vm11, %v657_v24, %v390_v28 }
 0xbd7   :  { %v399_v34 = vsel %vm396_vm12, %v398_v32, %v394_v31 }
 0xbd8   :  { %v412_v39 = vsub.f32 1.0, %v399_v34  ;;  %v418_v41 = vmul.f32 %v399_v34, %v354_v17 }
 0xc2e   :  { %v403_v33 = vpop.permute.xlu0 %402 }
 0xc2f   :  { %v405_v35 = vmul.f32 %v403_v33, %v399_v34 }
 0xc31   :  { %407 = vrot.lane.b32.xlu1 %v405_v35, %s673_s2 }
 0xca3   :  { %v408_v36 = vpop.permute.xlu1 %407 }
 0xca4   :  { %v410_v37 = vadd.f32 %v408_v36, %v380_v20 }
 0xca6   :  { %658 = vtanh.f32 %v410_v37 }
 0xcac   :  { %v659_v38 = vpop.eup %658 }
 0xcad   :  { %414 = vrot.lane.b32.xlu2 %v659_v38, %s674_s29 }
 0xd07   :  { %v415_v40 = vpop.permute.xlu2 %414 }
 0xd08   :  { %v417_v42 = vmul.f32 %v415_v40, %v412_v39 }
 0xd0a   :  { %v419_v43 = vadd.f32 %v418_v41, %v417_v42 }
 0xd0c   :  { %421 = vrot.lane.b32.xlu0 %v419_v43, %s674_s29 }
 0xd7e   :  { %v422_v44 = vpop.permute.xlu0 %421 }
 0xd7f   :  { %424 = vst.msk [vmem:[#allocation2 + $0xa] sm:$0x3] %vm98_vm5, %v422_v44  ;;  %613 = vmatmul.msk.f32.vlgmr.msrb.gmra.mxu2 %vm29_vm0, %v422_v44 }
 0xe02   :  { %v444_v45 = vpop.f32.mrf.mxu2 }
 0xe03   :  { %v445_v46 = vadd.f32 %v724_v5, %v444_v45 }
 0xe05   :  { %467 = vrot.lane.b32.xlu1 %v445_v46, %s672_s28  ;;  %v614_v47 = vmul.f32 -1.442695, %v445_v46 }
 0xe07   :  { %660 = vpow2.f32 %v614_v47 }
 0xe0d   :  { %v661_v48 = vpop.eup %660 }
 0xe0e   :  { %v450_v49 = vadd.f32 1.0, %v661_v48 }
 0xe10   :  { %662 = vrcp.f32 %v450_v49  ;;  %v462_v56 = vand.u32 2147483648, %v450_v49  ;;  %vm456_vm14 = vweird.f32 %v450_v49  ;;  %v460_v57 = vand.u32 2147483647, %v450_v49 }
 0xe12   :  { %v463_v59 = vor.u32 1.1754944e-38, %v462_v56  ;;  %vm461_vm1 = vcmp.eq.f32.partialorder %v460_v57, 8.507059e+37 }
 0xe16   :  { %v663_v50 = vpop.eup %662 }
 0xe17   :  { %v452_v51 = vmul.f32 %v663_v50, %v450_v49  ;;  %vm457_vm13 = vweird.f32 %v663_v50 }
 0xe18   :  { %vm458_vm15 = vmor %vm456_vm14, %vm457_vm13 }
 0xe19   :  { %v453_v52 = vsub.f32 1.0, %v452_v51 }
 0xe1b   :  { %v454_v53 = vmul.f32 %v663_v50, %v453_v52 }
 0xe1d   :  { %v455_v54 = vadd.f32 %v663_v50, %v454_v53 }
 0xe1f   :  { %v459_v58 = vsel %vm458_vm15, %v663_v50, %v455_v54 }
 0xe20   :  { %v464_v61 = vsel %vm461_vm1, %v463_v59, %v459_v58 }
 0xe21   :  { %v477_v2 = vsub.f32 1.0, %v464_v61  ;;  %v483_v4 = vmul.f32 %v464_v61, %v419_v43 }
 0xe77   :  { %v468_v60 = vpop.permute.xlu1 %467 }
 0xe78   :  { %v470_v62 = vmul.f32 %v468_v60, %v464_v61 }
 0xe7a   :  { %472 = vrot.lane.b32.xlu2 %v470_v62, %s673_s2 }
 0xed4   :  { %v473_v63 = vpop.permute.xlu2 %472 }
 0xed5   :  { %v475_v0 = vadd.f32 %v473_v63, %v445_v46 }
 0xed7   :  { %664 = vtanh.f32 %v475_v0 }
 0xedd   :  { %v665_v1 = vpop.eup %664 }
 0xede   :  { %479 = vrot.lane.b32.xlu0 %v665_v1, %s674_s29 }
 0xf50   :  { %v480_v3 = vpop.permute.xlu0 %479 }
 0xf51   :  { %v482_v6 = vmul.f32 %v480_v3, %v477_v2 }
 0xf53   :  { %v484_v7 = vadd.f32 %v483_v4, %v482_v6 }
 0xf55   :  { %486 = vrot.lane.b32.xlu1 %v484_v7, %s674_s29 }
 0xfc7   :  { %v487_v8 = vpop.permute.xlu1 %486 }
 0xfc8   :  { %489 = vst.msk [vmem:[#allocation2 + $0xc] sm:$0x3] %vm98_vm5, %v487_v8  ;;  %615 = vmatmul.msk.f32.vlgmr.msrb.gmra.mxu3 %vm29_vm0, %v487_v8 }
0x104b   :  { %v509_v9 = vpop.f32.mrf.mxu3 }
0x104c   :  { %v510_v10 = vadd.f32 %v724_v5, %v509_v9 }
0x104e   :  { %532 = vrot.lane.b32.xlu2 %v510_v10, %s672_s28  ;;  %v616_v11 = vmul.f32 -1.442695, %v510_v10 }
0x1050   :  { %666 = vpow2.f32 %v616_v11 }
0x1056   :  { %v667_v12 = vpop.eup %666 }
0x1057   :  { %v515_v13 = vadd.f32 1.0, %v667_v12 }
0x1059   :  { %668 = vrcp.f32 %v515_v13  ;;  %v527_v19 = vand.u32 2147483648, %v515_v13  ;;  %vm521_vm4 = vweird.f32 %v515_v13  ;;  %v525_v20 = vand.u32 2147483647, %v515_v13 }
0x105b   :  { %v528_v22 = vor.u32 1.1754944e-38, %v527_v19  ;;  %vm526_vm7 = vcmp.eq.f32.partialorder %v525_v20, 8.507059e+37 }
0x105f   :  { %v669_v14 = vpop.eup %668 }
0x1060   :  { %v517_v15 = vmul.f32 %v669_v14, %v515_v13  ;;  %vm522_vm2 = vweird.f32 %v669_v14 }
0x1061   :  { %vm523_vm6 = vmor %vm521_vm4, %vm522_vm2 }
0x1062   :  { %v518_v16 = vsub.f32 1.0, %v517_v15 }
0x1064   :  { %v519_v17 = vmul.f32 %v669_v14, %v518_v16 }
0x1066   :  { %v520_v18 = vadd.f32 %v669_v14, %v519_v17 }
0x1068   :  { %v524_v21 = vsel %vm523_vm6, %v669_v14, %v520_v18 }
0x1069   :  { %v529_v23 = vsel %vm526_vm7, %v528_v22, %v524_v21 }
0x106a   :  { %v542_v28 = vsub.f32 1.0, %v529_v23  ;;  %v548_v30 = vmul.f32 %v529_v23, %v484_v7 }
0x10a8   :  { %v533_v5 = vpop.permute.xlu2 %532 }
0x10a9   :  { %v535_v24 = vmul.f32 %v533_v5, %v529_v23 }
0x10ab   :  { %537 = vrot.lane.b32.xlu0 %v535_v24, %s673_s2 }
0x111d   :  { %v538_v25 = vpop.permute.xlu0 %537 }
0x111e   :  { %v540_v26 = vadd.f32 %v538_v25, %v510_v10 }
0x1120   :  { %670 = vtanh.f32 %v540_v26 }
0x1126   :  { %v671_v27 = vpop.eup %670 }
0x1127   :  { %544 = vrot.lane.b32.xlu1 %v671_v27, %s674_s29 }
0x1199   :  { %v545_v29 = vpop.permute.xlu1 %544 }
0x119a   :  { %v547_v31 = vmul.f32 %v545_v29, %v542_v28 }
0x119c   :  { %v549_v32 = vadd.f32 %v548_v30, %v547_v31 }
0x119e   :  { %551 = vrot.lane.b32.xlu2 %v549_v32, %s674_s29 }
0x11f8   :  { %v552_v33 = vpop.permute.xlu2 %551 }
0x11f9   :  { %554 = vst.msk [vmem:[#allocation2 + $0xe] sm:$0x3] %vm98_vm5, %v552_v33 }
0x1200   :  { %v556_v34 = vld [vmem:[#allocation2 + $0x8] sm:$0xff] }
0x1201   :  { %618 = vmatmul.msk.f32.gmra.mxu0 %vm29_vm0, %v556_v34 }
0x127e   :  { %v591_v35 = vpop.f32.mrf.mxu0 }
0x127f   :  { %v592_v36 = vadd.f32 %v773_v55, %v591_v35 }
0x1281   :  { %596 = vst.msk [vmem:[%s816_s5 + $0x8] sm:$0xff] %vm594_vm3, %v592_v36 }

</bundles_post_ra>
